<compile_context>
chip_gen: v7x
topology: tpu7x:2x2x1
jax: 0.10.0
libtpu: 0.0.40
codegen_flags: <defaults>
</compile_context>

<pallas_src>
import jax
import jax.numpy as jnp
from jax.experimental import pallas as pl
from jax.experimental.pallas import tpu as pltpu
from math import sqrt


# ----------------------------- small helpers --------------------------------------
def _round_up(x, m):
    return ((x + m - 1) // m) * m


def _sublane_tile(dtype):
    # minimal second-minor tile for the dtype's sublane packing: 8 f32, 16 bf16, 32 int8
    bits = jnp.dtype(dtype).itemsize * 8
    return max(8, 256 // bits)


def _vmem_budget_bytes():
    # Generation-aware budget: ~75% of physical VMEM (48 MiB on v7x, 96 MiB on v5e/v6e).
    try:
        cap = pltpu.get_tpu_info().vmem_capacity_bytes
    except Exception:
        cap = 64 * 1024 * 1024  # conservative fallback (v7x-sized)
    return int(cap * 0.75)


def _fused_vmem_bytes(tm_, in_features, hidden, tn, bpe):
    # x (2 bufs) + resident wh_t (single-buffered) + w_t (2 bufs) + out (2 bufs)
    # + h scratch, in the compute dtype; plus f32 bias and f32 matmul temporaries.
    return (bpe * (2 * tm_ * in_features + in_features * hidden
                   + 2 * hidden * tn + 2 * tm_ * tn + tm_ * hidden)
            + 4 * (2 * tn + tm_ * tn + tm_ * hidden))


def _maybe_split_for_megacore(tm_eff, M, sub, budget):
    # v7x (2 TensorCores, 64 MiB VMEM -> budget < 80 MiB): make sure the parallel i
    # axis has >= 2 blocks so both cores get work.  On 128 MiB single-TC parts keep
    # one big i-tile (splitting would only double w_t re-streaming).
    if budget < 80 * 1024 * 1024 and -(-M // tm_eff) < 2 and M > sub:
        tm_eff = _round_up(-(-M // 2), sub)
    return tm_eff


# ----------------------------- kernels ---------------------------------------------
def _elinear_fused_kernel(x_ref, wh_t_ref, w_t_ref, b_ref, o_ref, h_ref):
    # Grid: (i over M tiles [parallel], j over out_features tiles [arbitrary]).
    # x_ref:    (TM, in)        block index (i, 0)
    # wh_t_ref: (in, hidden)    resident (constant block index)
    # w_t_ref:  (hidden, TN)    block index (0, j)
    # b_ref:    (1, TN) f32     summed bias column tile
    # o_ref:    (TM, TN)
    # h_ref:    (TM, hidden)    VMEM scratch, compute dtype
    @pl.when(pl.program_id(1) == 0)
    def _():
        h = jnp.dot(x_ref[...], wh_t_ref[...], preferred_element_type=jnp.float32)
        # cast the cached activations (not the accumulator) to the compute dtype so
        # the second matmul runs at full bf16 MXU rate when inputs are bf16.
        h_ref[...] = h.astype(h_ref.dtype)

    y = jnp.dot(h_ref[...], w_t_ref[...], preferred_element_type=jnp.float32)
    o_ref[...] = (y + b_ref[...]).astype(o_ref.dtype)


def _matmul_bias_kernel(a_ref, b_ref, bias_ref, o_ref, acc_ref):
    # Generic K-tiled matmul + bias for the two-pass fallback path.
    @pl.when(pl.program_id(2) == 0)
    def _():
        acc_ref[...] = jnp.zeros_like(acc_ref)

    acc_ref[...] += jnp.dot(a_ref[...], b_ref[...], preferred_element_type=jnp.float32)

    @pl.when(pl.program_id(2) == pl.num_programs(2) - 1)
    def _():
        o_ref[...] = (acc_ref[...] + bias_ref[...]).astype(o_ref.dtype)


def _matmul_bias(a, b, bias, out_dtype, tm, tn, tk, vmem_limit):
    M, K = a.shape
    N = b.shape[1]
    grid = (M // tm, N // tn, K // tk)
    return pl.pallas_call(
        _matmul_bias_kernel,
        out_shape=jax.ShapeDtypeStruct((M, N), out_dtype),
        grid_spec=pltpu.PrefetchScalarGridSpec(
            num_scalar_prefetch=0,
            grid=grid,
            in_specs=[
                pl.BlockSpec((tm, tk), lambda i, j, k: (i, k)),
                pl.BlockSpec((tk, tn), lambda i, j, k: (k, j)),
                pl.BlockSpec((1, tn), lambda i, j, k: (0, j)),
            ],
            out_specs=pl.BlockSpec((tm, tn), lambda i, j, k: (i, j)),
            scratch_shapes=[pltpu.VMEM((tm, tn), jnp.float32)],
        ),
        compiler_params=pltpu.CompilerParams(
            dimension_semantics=("parallel", "parallel", "arbitrary"),
            vmem_limit_bytes=int(vmem_limit),
        ),
    )(a, b, bias)


# ----------------------------- parameter prep (once) -------------------------------
def elinear_prepare(weight_h, weight, bias=None, nbias=1, *, dtype=None, tn=256,
                    force_two_pass=False):
    """One-time parameter preparation (transpose, dtype-match, bias-sum, padding).

    weight_h: (hidden, in), weight: (out, hidden),
    bias: (nbias, out) if nbias > 1 else (out,) or None.
    """
    dtype = jnp.dtype(dtype if dtype is not None else weight_h.dtype)
    hidden, in_features = weight_h.shape
    out_features = weight.shape[0]

    wh_t = weight_h.T.astype(dtype)   # (in, hidden)
    w_t = weight.T.astype(dtype)      # (hidden, out)

    if bias is None:
        b = jnp.zeros((1, out_features), jnp.float32)
    elif nbias > 1:
        b = jnp.sum(bias, axis=0, keepdims=True).astype(jnp.float32)
    else:
        b = jnp.reshape(bias, (1, out_features)).astype(jnp.float32)

    # lane-dense output tiling: tn multiple of 128, out padded to a multiple of tn
    tn_eff = max(128, min(_round_up(tn, 128), _round_up(out_features, 128)))
    out_pad = _round_up(out_features, tn_eff)
    if out_pad != out_features:
        w_t = jnp.pad(w_t, ((0, 0), (0, out_pad - out_features)))
        b = jnp.pad(b, ((0, 0), (0, out_pad - out_features)))

    budget = _vmem_budget_bytes()
    vmem_limit = budget
    sub = _sublane_tile(dtype)
    bpe = dtype.itemsize

    fused_ok = (not force_two_pass) and (
        _fused_vmem_bytes(sub, in_features, hidden, tn_eff, bpe) <= int(budget * 0.85))

    params = dict(mode="fused" if fused_ok else "two_pass", dtype=dtype,
                  in_features=in_features, hidden=hidden, out_features=out_features,
                  out_pad=out_pad, tn=tn_eff, b=b, budget=budget,
                  vmem_limit=vmem_limit)

    if fused_ok:
        params.update(wh_t=wh_t, w_t=w_t)
    else:
        # Two-pass fallback: K-tile in_features (pass 1) and hidden (pass 2).
        ti = max(128, min(512, _round_up(in_features, 128)))
        in_pad = _round_up(in_features, ti)
        th = max(128, min(512, _round_up(hidden, 128)))
        hidden_pad = _round_up(hidden, th)
        wh_t2 = jnp.pad(wh_t, ((0, in_pad - in_features), (0, hidden_pad - hidden)))
        w_t2 = jnp.pad(w_t, ((0, hidden_pad - hidden), (0, 0)))
        zb = jnp.zeros((1, hidden_pad), jnp.float32)
        params.update(wh_t=wh_t2, w_t=w_t2, zb=zb, ti=ti, in_pad=in_pad,
                      th=th, hidden_pad=hidden_pad)
    return params


# ----------------------------- forward ----------------------------------------------
def elinear_forward(x, params, *, tm=None):
    p = params
    dtype = p["dtype"]
    in_features, hidden = p["in_features"], p["hidden"]
    out_features, out_pad, tn = p["out_features"], p["out_pad"], p["tn"]
    budget, vmem_limit = p["budget"], p["vmem_limit"]

    lead = x.shape[:-1]
    M = 1
    for d in lead:
        M *= d
    if jnp.dtype(x.dtype) != dtype:
        x = x.astype(dtype)             # dtype-match activations to prepared weights
    x2d = x.reshape(M, in_features)

    sub = _sublane_tile(dtype)
    bpe = dtype.itemsize
    if tm is None:
        tm = 512 if budget >= 80 * 1024 * 1024 else 256   # big-VMEM parts: bigger rows
    tm_eff = max(sub, min(_round_up(tm, sub), _round_up(M, sub)))

    if p["mode"] == "fused":
        wh_t, w_t, b = p["wh_t"], p["w_t"], p["b"]
        fit = int(budget * 0.85)
        while _fused_vmem_bytes(tm_eff, in_features, hidden, tn, bpe) > fit and tm_eff > sub:
            tm_eff = max(sub, _round_up(tm_eff // 2, sub))
        tm_eff = _maybe_split_for_megacore(tm_eff, M, sub, budget)

        M_pad = _round_up(M, tm_eff)
        if M_pad != M:
            x2d = jnp.pad(x2d, ((0, M_pad - M), (0, 0)))
        grid = (M_pad // tm_eff, out_pad // tn)

        cost = pl.CostEstimate(
            flops=2 * M_pad * in_features * hidden + 2 * M_pad * hidden * out_pad,
            transcendentals=0,
            bytes_accessed=(M_pad * in_features * bpe
                            + in_features * hidden * bpe
                            + grid[0] * hidden * out_pad * bpe   # w_t re-streamed per i-tile
                            + grid[0] * out_pad * 4
                            + M_pad * out_pad * bpe),
        )

        def call_fused(single_buffer_resident):
            if single_buffer_resident:
                # constant-index resident panel: second pipeline buffer is pure waste
                wh_spec = pl.BlockSpec((in_features, hidden), lambda i, j: (0, 0),
                                       pipeline_mode=pl.Buffered(1))
            else:
                wh_spec = pl.BlockSpec((in_features, hidden), lambda i, j: (0, 0))
            return pl.pallas_call(
                _elinear_fused_kernel,
                out_shape=jax.ShapeDtypeStruct((M_pad, out_pad), dtype),
                grid_spec=pltpu.PrefetchScalarGridSpec(
                    num_scalar_prefetch=0,
                    grid=grid,
                    in_specs=[
                        pl.BlockSpec((tm_eff, in_features), lambda i, j: (i, 0)),
                        wh_spec,
                        pl.BlockSpec((hidden, tn), lambda i, j: (0, j)),
                        pl.BlockSpec((1, tn), lambda i, j: (0, j)),
                    ],
                    out_specs=pl.BlockSpec((tm_eff, tn), lambda i, j: (i, j)),
                    scratch_shapes=[pltpu.VMEM((tm_eff, hidden), dtype)],
                ),
                compiler_params=pltpu.CompilerParams(
                    dimension_semantics=("parallel", "arbitrary"),
                    vmem_limit_bytes=int(vmem_limit),
                ),
                cost_estimate=cost,
            )(x2d, wh_t, w_t, b)

        try:
            out2d = call_fused(True)
        except Exception:
            # jax version without pipeline_mode / Buffered(1): default double buffering
            out2d = call_fused(False)

    else:
        # Two-pass K-tiled fallback (resident Wh^T panel would not fit VMEM, e.g. v7x
        # with very large in_features*hidden): h round-trips HBM once.
        ti, in_pad, th, hidden_pad = p["ti"], p["in_pad"], p["th"], p["hidden_pad"]
        tm_eff = _maybe_split_for_megacore(tm_eff, M, sub, budget)
        M_pad = _round_up(M, tm_eff)
        x2d = jnp.pad(x2d, ((0, M_pad - M), (0, in_pad - in_features)))
        h = _matmul_bias(x2d, p["wh_t"], p["zb"], dtype, tm_eff, th, ti, vmem_limit)
        out2d = _matmul_bias(h, p["w_t"], p["b"], dtype, tm_eff, tn, th, vmem_limit)

    out2d = out2d[:M, :out_features]
    return out2d.reshape(*lead, out_features)


# ----------------------------- example / self-test ---------------------------------
def _kaiming_uniform_like(key, shape, gain):
    fan_in = shape[1]
    bound = gain * sqrt(3.0 / fan_in)
    return jax.random.uniform(key, shape, dtype=jnp.float32, minval=-bound, maxval=bound)


if __name__ == "__main__":
    batch, seq = 2, 8
    in_features, out_features = 32, 48
    hidden_features = min(in_features, out_features)   # module default
    nbias = 2

    key = jax.random.PRNGKey(0)
    k_wh, k_w, k_b, k_x = jax.random.split(key, 4)

    gain = sqrt(1.0 / 3.0)
    weight_h = _kaiming_uniform_like(k_wh, (hidden_features, in_features), gain)
    weight = _kaiming_uniform_like(k_w, (out_features, hidden_features), gain)

    bound = 1.0 / sqrt(in_features) / float(nbias)
    bias = jax.random.uniform(k_b, (nbias, out_features), dtype=jnp.float32,
                              minval=-bound, maxval=bound)

    x = jax.random.normal(k_x, (batch, seq, in_features), dtype=jnp.float32)
    ref = (x @ weight_h.T) @ weight.T + jnp.sum(bias, axis=0)

    # 1) fused f32 path (h cached in VMEM scratch across the j axis)
    params = elinear_prepare(weight_h, weight, bias, nbias=nbias)
    out = jax.block_until_ready(elinear_forward(x, params))
    assert out.shape == (batch, seq, out_features)
    assert jnp.allclose(out, ref, atol=1e-5, rtol=1e-5), "fused f32 mismatch"

    # 2) bf16 path (weights dtype-matched to activations at prepare time)
    params_bf = elinear_prepare(weight_h, weight, bias, nbias=nbias, dtype=jnp.bfloat16)
    out_bf = jax.block_until_ready(elinear_forward(x.astype(jnp.bfloat16), params_bf))
    wh_b = weight_h.astype(jnp.bfloat16).astype(jnp.float32)
    w_b = weight.astype(jnp.bfloat16).astype(jnp.float32)
    h_b = (x.astype(jnp.bfloat16).astype(jnp.float32) @ wh_b.T)
    h_b = h_b.astype(jnp.bfloat16).astype(jnp.float32)
    ref_bf = h_b @ w_b.T + jnp.sum(bias, axis=0)
    assert jnp.allclose(out_bf.astype(jnp.float32), ref_bf, atol=2e-2, rtol=2e-2), \
        "fused bf16 mismatch"

    # 3) two-pass K-tiled fallback path, forced for coverage
    params_tp = elinear_prepare(weight_h, weight, bias, nbias=nbias, force_two_pass=True)
    out_tp = jax.block_until_ready(elinear_forward(x, params_tp))
    assert jnp.allclose(out_tp, ref, atol=1e-5, rtol=1e-5), "two-pass mismatch"

    print("KERNEL_OK")
</pallas_src>

<mosaic_0001>
module attributes {stable_mosaic.version = 11 : i64} {
  func.func @_elinear_fused_kernel(%arg0: i32, %arg1: i32, %arg2: memref<8x32xf32, #tpu.memory_space<vmem>>, %arg3: memref<32x32xf32, #tpu.memory_space<vmem>>, %arg4: memref<32x128xf32, #tpu.memory_space<vmem>>, %arg5: memref<1x128xf32, #tpu.memory_space<vmem>>, %arg6: memref<8x128xf32, #tpu.memory_space<vmem>>, %arg7: memref<8x32xf32, #tpu.memory_space<vmem>>) attributes {dimension_semantics = [#tpu.dimension_semantics<parallel>, #tpu.dimension_semantics<arbitrary>], iteration_bounds = array<i64: 2, 1>, scalar_prefetch = 0 : i64, scratch_operands = 1 : i64, tpu.core_type = #tpu.core_type<tc>, window_params = [{transform_indices = @transform_0, window_bounds = array<i64: 8, 32>}, {pipeline_mode = #tpu.pipeline_mode<synchronous>, transform_indices = @transform_1, window_bounds = array<i64: 32, 32>}, {transform_indices = @transform_2, window_bounds = array<i64: 32, 128>}, {transform_indices = @transform_3, window_bounds = array<i64: 1, 128>}, {transform_indices = @transform_4, window_bounds = array<i64: 8, 128>}]} {
    %c0_i32 = arith.constant 0 : i32
    %0 = arith.cmpi eq, %arg1, %c0_i32 : i32
    %1 = arith.extui %0 : i1 to i32
    %c0_i32_0 = arith.constant 0 : i32
    %2 = arith.cmpi ne, %1, %c0_i32_0 : i32
    scf.if %2 {
      %c0_8 = arith.constant 0 : index
      %c0_9 = arith.constant 0 : index
      %10 = vector.load %arg2[%c0_8, %c0_9] : memref<8x32xf32, #tpu.memory_space<vmem>>, vector<8x32xf32>
      %c0_10 = arith.constant 0 : index
      %c0_11 = arith.constant 0 : index
      %11 = vector.load %arg3[%c0_10, %c0_11] : memref<32x32xf32, #tpu.memory_space<vmem>>, vector<32x32xf32>
      %cst_12 = arith.constant dense<0.000000e+00> : vector<8x32xf32>
      %12 = tpu.matmul %10, %11, %cst_12 {dimension_numbers = #tpu.dot_dimension_numbers<[1], [0], [0], [1], [0, 0, 1, 1], [], []>} : vector<8x32xf32>, vector<32x32xf32>, vector<8x32xf32> -> vector<8x32xf32>
      %c0_13 = arith.constant 0 : index
      %c0_14 = arith.constant 0 : index
      %13 = vector.load %arg7[%c0_13, %c0_14] : memref<8x32xf32, #tpu.memory_space<vmem>>, vector<8x32xf32>
      tpu.vector_store %arg7[%c0_13, %c0_14], %12 {strides = array<i32>} : memref<8x32xf32, #tpu.memory_space<vmem>>, vector<8x32xf32>,
    } else {
    }
    %c0 = arith.constant 0 : index
    %c0_1 = arith.constant 0 : index
    %3 = vector.load %arg7[%c0, %c0_1] : memref<8x32xf32, #tpu.memory_space<vmem>>, vector<8x32xf32>
    %c0_2 = arith.constant 0 : index
    %c0_3 = arith.constant 0 : index
    %4 = vector.load %arg4[%c0_2, %c0_3] : memref<32x128xf32, #tpu.memory_space<vmem>>, vector<32x128xf32>
    %cst = arith.constant dense<0.000000e+00> : vector<8x128xf32>
    %5 = tpu.matmul %3, %4, %cst {dimension_numbers = #tpu.dot_dimension_numbers<[1], [0], [0], [1], [0, 0, 1, 1], [], []>} : vector<8x32xf32>, vector<32x128xf32>, vector<8x128xf32> -> vector<8x128xf32>
    %c0_4 = arith.constant 0 : index
    %c0_5 = arith.constant 0 : index
    %6 = vector.load %arg5[%c0_4, %c0_5] : memref<1x128xf32, #tpu.memory_space<vmem>>, vector<1x128xf32>
    %7 = vector.broadcast %6 : vector<1x128xf32> to vector<8x128xf32>
    %8 = arith.addf %5, %7 : vector<8x128xf32>
    %c0_6 = arith.constant 0 : index
    %c0_7 = arith.constant 0 : index
    %9 = vector.load %arg6[%c0_6, %c0_7] : memref<8x128xf32, #tpu.memory_space<vmem>>, vector<8x128xf32>
    tpu.vector_store %arg6[%c0_6, %c0_7], %8 {strides = array<i32>} : memref<8x128xf32, #tpu.memory_space<vmem>>, vector<8x128xf32>,
    return
  }
  func.func @transform_0(%arg0: i32, %arg1: i32) -> (i32, i32) {
    %c0_i32 = arith.constant 0 : i32
    %c0_i32_0 = arith.constant 0 : i32
    return %arg0, %c0_i32 : i32, i32
  }
  func.func @transform_1(%arg0: i32, %arg1: i32) -> (i32, i32) {
    %c0_i32 = arith.constant 0 : i32
    %c0_i32_0 = arith.constant 0 : i32
    %c0_i32_1 = arith.constant 0 : i32
    return %c0_i32, %c0_i32_0 : i32, i32
  }
  func.func @transform_2(%arg0: i32, %arg1: i32) -> (i32, i32) {
    %c0_i32 = arith.constant 0 : i32
    %c0_i32_0 = arith.constant 0 : i32
    return %c0_i32, %arg1 : i32, i32
  }
  func.func @transform_3(%arg0: i32, %arg1: i32) -> (i32, i32) {
    %c0_i32 = arith.constant 0 : i32
    %c0_i32_0 = arith.constant 0 : i32
    return %c0_i32, %arg1 : i32, i32
  }
  func.func @transform_4(%arg0: i32, %arg1: i32) -> (i32, i32) {
    %c0_i32 = arith.constant 0 : i32
    return %arg0, %arg1 : i32, i32
  }
}

module attributes {stable_mosaic.version = 11 : i64} {
  func.func @_elinear_fused_kernel(%arg0: i32, %arg1: i32, %arg2: memref<8x32xf32, #tpu.memory_space<vmem>>, %arg3: memref<32x32xf32, #tpu.memory_space<vmem>>, %arg4: memref<32x128xf32, #tpu.memory_space<vmem>>, %arg5: memref<1x128xf32, #tpu.memory_space<vmem>>, %arg6: memref<8x128xf32, #tpu.memory_space<vmem>>, %arg7: memref<8x32xf32, #tpu.memory_space<vmem>>) attributes {dimension_semantics = [#tpu.dimension_semantics<parallel>, #tpu.dimension_semantics<arbitrary>], iteration_bounds = array<i64: 2, 1>, scalar_prefetch = 0 : i64, scratch_operands = 1 : i64, tpu.core_type = #tpu.core_type<tc>, window_params = [{transform_indices = @transform_0, window_bounds = array<i64: 8, 32>}, {pipeline_mode = #tpu.pipeline_mode<synchronous>, transform_indices = @transform_1, window_bounds = array<i64: 32, 32>}, {transform_indices = @transform_2, window_bounds = array<i64: 32, 128>}, {transform_indices = @transform_3, window_bounds = array<i64: 1, 128>}, {transform_indices = @transform_4, window_bounds = array<i64: 8, 128>}]} {
    %c0_i32 = arith.constant 0 : i32
    %0 = arith.cmpi eq, %arg1, %c0_i32 : i32
    %1 = arith.extui %0 : i1 to i32
    %c0_i32_0 = arith.constant 0 : i32
    %2 = arith.cmpi ne, %1, %c0_i32_0 : i32
    scf.if %2 {
      %c0_8 = arith.constant 0 : index
      %c0_9 = arith.constant 0 : index
      %10 = vector.load %arg2[%c0_8, %c0_9] : memref<8x32xf32, #tpu.memory_space<vmem>>, vector<8x32xf32>
      %c0_10 = arith.constant 0 : index
      %c0_11 = arith.constant 0 : index
      %11 = vector.load %arg3[%c0_10, %c0_11] : memref<32x32xf32, #tpu.memory_space<vmem>>, vector<32x32xf32>
      %cst_12 = arith.constant dense<0.000000e+00> : vector<8x32xf32>
      %12 = tpu.matmul %10, %11, %cst_12 {dimension_numbers = #tpu.dot_dimension_numbers<[1], [0], [0], [1], [0, 0, 1, 1], [], []>} : vector<8x32xf32>, vector<32x32xf32>, vector<8x32xf32> -> vector<8x32xf32>
      %c0_13 = arith.constant 0 : index
      %c0_14 = arith.constant 0 : index
      %13 = vector.load %arg7[%c0_13, %c0_14] : memref<8x32xf32, #tpu.memory_space<vmem>>, vector<8x32xf32>
      tpu.vector_store %arg7[%c0_13, %c0_14], %12 {strides = array<i32>} : memref<8x32xf32, #tpu.memory_space<vmem>>, vector<8x32xf32>,
    } else {
    }
    %c0 = arith.constant 0 : index
    %c0_1 = arith.constant 0 : index
    %3 = vector.load %arg7[%c0, %c0_1] : memref<8x32xf32, #tpu.memory_space<vmem>>, vector<8x32xf32>
    %c0_2 = arith.constant 0 : index
    %c0_3 = arith.constant 0 : index
    %4 = vector.load %arg4[%c0_2, %c0_3] : memref<32x128xf32, #tpu.memory_space<vmem>>, vector<32x128xf32>
    %cst = arith.constant dense<0.000000e+00> : vector<8x128xf32>
    %5 = tpu.matmul %3, %4, %cst {dimension_numbers = #tpu.dot_dimension_numbers<[1], [0], [0], [1], [0, 0, 1, 1], [], []>} : vector<8x32xf32>, vector<32x128xf32>, vector<8x128xf32> -> vector<8x128xf32>
    %c0_4 = arith.constant 0 : index
    %c0_5 = arith.constant 0 : index
    %6 = vector.load %arg5[%c0_4, %c0_5] : memref<1x128xf32, #tpu.memory_space<vmem>>, vector<1x128xf32>
    %7 = vector.broadcast %6 : vector<1x128xf32> to vector<8x128xf32>
    %8 = arith.addf %5, %7 : vector<8x128xf32>
    %c0_6 = arith.constant 0 : index
    %c0_7 = arith.constant 0 : index
    %9 = vector.load %arg6[%c0_6, %c0_7] : memref<8x128xf32, #tpu.memory_space<vmem>>, vector<8x128xf32>
    tpu.vector_store %arg6[%c0_6, %c0_7], %8 {strides = array<i32>} : memref<8x128xf32, #tpu.memory_space<vmem>>, vector<8x128xf32>,
    return
  }
  func.func @transform_0(%arg0: i32, %arg1: i32) -> (i32, i32) {
    %c0_i32 = arith.constant 0 : i32
    %c0_i32_0 = arith.constant 0 : i32
    return %arg0, %c0_i32 : i32, i32
  }
  func.func @transform_1(%arg0: i32, %arg1: i32) -> (i32, i32) {
    %c0_i32 = arith.constant 0 : i32
    %c0_i32_0 = arith.constant 0 : i32
    %c0_i32_1 = arith.constant 0 : i32
    return %c0_i32, %c0_i32_0 : i32, i32
  }
  func.func @transform_2(%arg0: i32, %arg1: i32) -> (i32, i32) {
    %c0_i32 = arith.constant 0 : i32
    %c0_i32_0 = arith.constant 0 : i32
    return %c0_i32, %arg1 : i32, i32
  }
  func.func @transform_3(%arg0: i32, %arg1: i32) -> (i32, i32) {
    %c0_i32 = arith.constant 0 : i32
    %c0_i32_0 = arith.constant 0 : i32
    return %c0_i32, %arg1 : i32, i32
  }
  func.func @transform_4(%arg0: i32, %arg1: i32) -> (i32, i32) {
    %c0_i32 = arith.constant 0 : i32
    return %arg0, %arg1 : i32, i32
  }
}

</mosaic_0001>

<bundles_post_ra>
// kernel: tpu_custom_call.1
= control target key start
LH: loop header
LB: loop body
LE: loop exit
PB: predicated region body
PF: predicated region fallthrough
CT: control target
= control target key end

     0   :  { %9 = vsyncpa [#allocation4], 0  ;;  %s1193_s0 = inlined_call_operand.hbm [shape: f32[16,32], index: 0, kind: input, shape index: {}]   ;;  %s1194_s1 = inlined_call_operand.hbm [shape: f32[32,32], index: 1, kind: input, shape index: {}]   ;;  %s1195_s2 = inlined_call_operand.hbm [shape: f32[32,128], index: 2, kind: input, shape index: {}]   ;;  %s1196_s3 = inlined_call_operand.vmem [shape: f32[1,128], index: 3, kind: input, shape index: {}]   ;;  %s1197_s4 = inlined_call_operand.hbm [shape: f32[16,128], index: 4, kind: output, shape index: {}]  }
   0x1   :  { %11 = vsyncpa [#allocation4 + $0x1], 0 }
   0x2   :  { %12 = vsyncpa [#allocation7], 0 }
   0x3   :  { %13 = vsyncpa [#allocation5], 0 }
   0x4   :  { %15 = vsyncpa [#allocation5 + $0x1], 0  ;;  %s936_s15 = smov 0   ;;  %s938_s16 = smov 0  }
   0x5   :  { %s940_s17 = smov 0   ;;  %s942_s18 = smov 0  }
   0x6   :  { %s944_s19 = smov 0   ;;  %s946_s20 = smov 0  }
   0x7 LB: > { %s575_s21 = sadd.s32 4294967295, %s900_s20   ;;  %s576_s22 = sadd.s32 4294967294, %s900_s20   ;;  %s900_s20 = sphi %s946_s20, %s21_s20   ;;  %s896_s19 = sphi %s944_s19, %s1219_s19   ;;  %s892_s18 = sphi %s942_s18, %s1218_s18   ;;  %s888_s17 = sphi %s940_s17, %s1217_s17   ;;  %s884_s16 = sphi %s938_s16, %s1216_s16   ;;  %s880_s15 = sphi %s936_s15, %s1215_s15  }
   0x8   : > { %p53_p0 = scmp.ne.s32.totalorder %s884_s16, %s880_s15  ;;  %p970_p1 = scmp.eq.s32.totalorder %s575_s21, 0 }
   0x9   : > { %p974_p2 = scmp.eq.s32.totalorder %s575_s21, 1  ;;  %p158_p3 = scmp.eq.s32.totalorder %s576_s22, 1 }
   0xa   : > { %s1202_s23 = scalar_select %p970_p1, 1, 0 }
   0xb   : > { %p980_p4 = por %p970_p1, %p53_p0  ;;  %p577_p5 = scmp.ge.s32.totalorder %s900_s20, 1 }
   0xc   : > { %p985_p6 = por %p158_p3, %p53_p0  ;;  %p165_p7 = scmp.lt.s32.totalorder %s900_s20, 3 }
   0xd   : > { %s1204_s25 = scalar_select %p980_p4, 1, 0 }
   0xe   : > { %s1205_s26 = scalar_select %p985_p6, 1, 0 }
   0xf   : > { %p990_p8 = pnand %p577_p5, %p165_p7  ;;  %s902_s28 = smov [#allocation6]  }
  0x10   : > { %s177_s29 = sshll.u32 %s902_s28, 4  ;;  %s903_s5 = smov [#allocation8]   ;;  %s994_s29 = int_to_ptr.vmem [resolvable:$true] %s177_s29 }
  0x11   : > { %p652_p9 = pneg %p990_p8  ;;  %s192_s6 = sshll.u32 %s903_s5, 4  ;;  %s1005_s6 = int_to_ptr.vmem [resolvable:$true] %s192_s6 }
  0x12   : > { %s728_s9 = scalar_lea.hbm %s1194_s1, 512 }
  0x13   : > { %p1001_p11 = pnand %p652_p9, %p970_p1  ;;  %p729_p12 = scmp.ne.s32.totalorder %s1194_s1, %s728_s9 }
  0x14   : > { %p735_p5 = scmp.lt.u32.totalorder %s728_s9, %s1194_s1 }
  0x15   : > { %p730_p13 = pneg %p1001_p11 }
  0x17   : > { %p731_p0 = pnand %p730_p13, %p729_p12 }
  0x19   : > { %p732_p3 = pneg %p731_p0 }
  0x1b   : > { %p737_p7 = pnand %p735_p5, %p732_p3 }
  0x1d   : > { %740 = shalt.err (!%p737_p7)
}
  0x1e   : > { %s741_s14 = scalar_lea.vmem %s994_s29, 512  ;;  %p749_p1 = scmp.lt.s32.totalorder %s994_s29, %s994_s29 }
  0x1f   : > { %p742_p9 = scmp.ne.s32.totalorder %s994_s29, %s741_s14  ;;  %p750_p12 = scmp.lt.s32.totalorder %s741_s14, %s741_s14 }
  0x21   : > { %p744_p10 = pnand %p742_p9, %p730_p13  ;;  %p751_p0 = por %p750_p12, %p749_p1 }
  0x23   : > { %p745_p6 = pneg %p744_p10 }
  0x25   : > { %p752_p4 = pnand %p751_p0, %p745_p6 }
  0x27   : > { %755 = shalt.err (!%p752_p4)
}
  0x28   : > { %s904_s21 = smov 128   ;;  %s905_s22 = smov 8  }
  0x29   : > { %655 = dma.hbm_to_vmem [thread:$0]  (!%p1001_p11), %s1194_s1, 512, %s994_s29, [#allocation7], %s904_s21, %s904_s21, %s905_s22  }
  0x2a   : > { %s756_s9 = scalar_lea.hbm %s1195_s2, 512 }
  0x2b   : > { %p757_p1 = scmp.ne.s32.totalorder %s1195_s2, %s756_s9  ;;  %p763_p10 = scmp.lt.u32.totalorder %s756_s9, %s1195_s2 }
  0x2d   : > { %p759_p4 = pnand %p757_p1, %p730_p13 }
  0x2f   : > { %p760_p6 = pneg %p759_p4 }
  0x31   : > { %p765_p3 = pnand %p763_p10, %p760_p6 }
  0x33   : > { %768 = shalt.err (!%p765_p3)
}
  0x34   : > { %s769_s29 = scalar_lea.vmem %s1005_s6, 512  ;;  %p777_p12 = scmp.lt.s32.totalorder %s1005_s6, %s1005_s6 }
  0x35   : > { %p770_p5 = scmp.ne.s32.totalorder %s1005_s6, %s769_s29  ;;  %p778_p0 = scmp.lt.s32.totalorder %s769_s29, %s769_s29 }
  0x37   : > { %p772_p7 = pnand %p770_p5, %p730_p13  ;;  %p779_p1 = por %p778_p0, %p777_p12 }
  0x39   : > { %p773_p9 = pneg %p772_p7 }
  0x3b   : > { %p780_p4 = pnand %p779_p1, %p773_p9 }
  0x3d   : > { %783 = shalt.err (!%p780_p4)
}
  0x3e   : > { %658 = dma.hbm_to_vmem [thread:$0]  (!%p1001_p11), %s1195_s2, 512, %s1005_s6, [#allocation7], %s904_s21, %s904_s21, %s905_s22  }
  0x3f   : > { %s33_s5 = sadd.s32 1, %s896_s19  ;;  %s40_s7 = sadd.s32 1, %s888_s17 }
  0x40   : > { %p35_p13 = scmp.ge.s32.totalorder %s33_s5, 2  ;;  %p47_p6 = scmp.ne.s32.totalorder %s888_s17, %s884_s16 }
  0x41   : > { %p48_p10 = scmp.eq.s32.totalorder %s900_s20, 0  ;;  %p669_p3 = scmp.lt.s32.totalorder %s900_s20, 2 }
  0x42   : > { %s1221_s5 = smov (%p35_p13, %s33_s5), 0  ;;  %p1069_p7 = por %p974_p2, %p47_p6 }
  0x43   : > { %p49_p5 = por %p48_p10, %p47_p6  ;;  %s37_s8 = ssub.s32 %s896_s19, %s1221_s5 }
  0x44   : > { %s1208_s30 = scalar_select %p1069_p7, 1, 0 }
  0x45   : > { %s212_s9 = sand.u32 1, %s888_s17   ;;  %p38_p9 = scmp.eq.s32.totalorder %s37_s8, 0 }
  0x46   : > { %s582_s6 = sshll.u32 %s212_s9, 3  ;;  %s583_s21 = sshll.u32 %s896_s19, 7 }
  0x47   : > { %s1078_s22 = scalar_select %p38_p9, %s888_s17, %s40_s7  }
  0x48   : > { %s1083_s12 = scalar_lea.hbm %s1193_s0, %s583_s21  ;;  %s216_s24 = scalar_lea.vmem [#allocation3], %s582_s6 }
  0x49   : > { %s223_s13 = sshll.u32 %s216_s24, 4  ;;  %p1087_p2 = pnand %p669_p3, %p49_p5  ;;  %s1091_s13 = int_to_ptr.vmem [resolvable:$true] %s223_s13 }
  0x4a   : > { %s213_s14 = scalar_lea.sflag [#allocation4], %s212_s9  ;;  %s784_s28 = scalar_lea.hbm %s1083_s12, 128 }
  0x4b   : > { %p785_p11 = scmp.ne.s32.totalorder %s1083_s12, %s784_s28  ;;  %p786_p12 = pneg %p1087_p2 }
  0x4c   : > { %s789_s6 = scalar_lea.hbm %s1193_s0, 256  ;;  %p790_p4 = scmp.lt.u32.totalorder %s1083_s12, %s1193_s0 }
  0x4d   : > { %p787_p0 = pnand %p786_p12, %p785_p11  ;;  %p791_p13 = scmp.lt.u32.totalorder %s789_s6, %s784_s28 }
  0x4e   : > { %p793_p10 = scmp.lt.u32.totalorder %s784_s28, %s1083_s12 }
  0x4f   : > { %p788_p1 = pneg %p787_p0  ;;  %p792_p6 = por %p791_p13, %p790_p4 }
  0x51   : > { %p794_p3 = por %p793_p10, %p792_p6 }
  0x53   : > { %p795_p5 = pnand %p794_p3, %p788_p1 }
  0x55   : > { %798 = shalt.err (!%p795_p5)
}
  0x56   : > { %s799_s9 = scalar_lea.vmem %s1091_s13, 128  ;;  %s906_s11 = smov [#allocation3]  }
  0x57   : > { %p800_p9 = scmp.ne.s32.totalorder %s1091_s13, %s799_s9  ;;  %s804_s24 = sshll.u32 %s906_s11, 4  ;;  %s805_s24 = int_to_ptr.vmem [resolvable:$false] %s804_s24 }
  0x58   : > { %s806_s7 = scalar_lea.vmem %s805_s24, 256  ;;  %p807_p7 = scmp.lt.s32.totalorder %s1091_s13, %s805_s24 }
  0x59   : > { %p802_p11 = pnand %p800_p9, %p786_p12  ;;  %p808_p4 = scmp.lt.s32.totalorder %s806_s7, %s799_s9 }
  0x5b   : > { %p803_p0 = pneg %p802_p11  ;;  %p809_p13 = por %p808_p4, %p807_p7 }
  0x5d   : > { %p810_p6 = pnand %p809_p13, %p803_p0 }
  0x5f   : > { %813 = shalt.err (!%p810_p6)
}
  0x60   : > { %662 = dma.hbm_to_vmem [thread:$0]  (!%p1087_p2), %s1083_s12, 128, %s1091_s13, %s213_s14  }
  0x61   : > { %232 = sbr.rel (%p990_p8) target bundleno = 567 (0x237), region = 36  ;;  %s1121_s28 = sand.u32 (!%p990_p8), 1, %s884_s16  }
  0x62   : > { %s585_s8 = sshll.u32 (!%p990_p8), %s1121_s28, 3  ;;  %s235_s6 = scalar_lea.sflag (!%p990_p8), [#allocation4], %s1121_s28 }
  0x63   : > { %s238_s21 = scalar_lea.vmem (!%p990_p8), [#allocation3], %s585_s8  ;;  %p1210_p7 = scmp.ne.s32.totalorder (!%p990_p8), %s1204_s25, 0 }
  0x68   : > { %867 = dma.done.wait (%p1210_p7), %s235_s6, 128  }
  0x69   : > { %869 = vsyncadd (%p1210_p7), %s235_s6, 4294967168  ;;  %p1211_p2 = scmp.ne.s32.totalorder %s1202_s23, 0 }
  0x6b   : > { %871 = dma.done.wait (%p1211_p2), [#allocation7], 1024  }
  0x6c   : > { %873 = vsyncadd (%p1211_p2), [#allocation7], 4294966272  ;;  %v907_v0 = vmov 0.0|0.0   ;;  %vm908_vm0 = vmmov 0   ;;  %v909_v1 = vmov 0.0   ;;  %v282_v2 = vld [vmem:[#allocation6] sm:$0xff] }
  0x6d   : > { %628 = vmatprep.subr.bf16.mxu0 %v907_v0  ;;  %614 = vmatprep.mubr.msk.f32.mxu0 %vm908_vm0, %v909_v1  ;;  %v283_v3 = vld [vmem:[#allocation6 + $0x8] sm:$0xff]  ;;  %v284_v4 = vld [vmem:[#allocation6 + $0x10] sm:$0xff]  ;;  %v285_v6 = vld [vmem:[#allocation6 + $0x18] sm:$0xff]  ;;  %vm286_vm1 = vcmask 261120   ;;  %s593_s27 = sshll.u32 %s892_s18, 7  ;;  %s273_s12 = scalar_lea.vmem [#allocation9], %s585_s8 }
  0x6e   : > { %634 = vmatprep.subr.bf16.mxu1 %v907_v0  ;;  %625 = vmatprep.mubr.msk.f32.mxu1 %vm908_vm0, %v909_v1  ;;  %v629_v5 = vpack.c.bf16 %v283_v3, %v282_v2  ;;  %v632_v7 = vpack.c.bf16 %v285_v6, %v284_v4  ;;  %v281_v8 = vld [vmem:[%s238_s21] sm:$0xff]  ;;  %v362_v9 = vld [vmem:[#allocation8] sm:$0xff]  ;;  %v363_v10 = vld [vmem:[#allocation8 + $0x8] sm:$0xff]  ;;  %s463_s13 = sshll.u32 %s273_s12, 4  ;;  %s1144_s10 = scalar_lea.hbm %s1197_s4, %s593_s27  ;;  %s1146_s13 = int_to_ptr.vmem [resolvable:$true] %s463_s13 }
  0x6f   : > { %v635_v11 = vpack.c.bf16 %v363_v10, %v362_v9  ;;  %v364_v12 = vld [vmem:[#allocation8 + $0x10] sm:$0xff]  ;;  %v365_v13 = vld [vmem:[#allocation8 + $0x18] sm:$0xff]  ;;  %v590_v18 = vld [vmem:[%s1196_s3] ss:$0 sm:$0xff]  ;;  %s449_s9 = scalar_lea.sflag [#allocation5], %s1121_s28  ;;  %s814_s11 = scalar_lea.vmem %s1146_s13, 128 }
  0x70   : > { %630 = vmatpush3.bf16.msra.mxu0 %v629_v5  ;;  %v638_v14 = vpack.c.bf16 %v365_v13, %v364_v12  ;;  %p815_p8 = scmp.ne.s32.totalorder %s1146_s13, %s814_s11  ;;  %p1212_p12 = scmp.ne.s32.totalorder %s1208_s30, 0 }
  0x71   : > { %631 = vmatprep.subr.bf16.mxu0 %v907_v0  ;;  %636 = vmatpush3.bf16.msra.mxu1 %v635_v11  ;;  %s910_s18 = smov [#allocation9]  }
  0x72   : > { %637 = vmatprep.subr.bf16.mxu1 %v907_v0  ;;  %p816_p1 = pnand %p815_p8, %p1212_p12  ;;  %s818_s24 = sshll.u32 %s910_s18, 4  ;;  %s819_s24 = int_to_ptr.vmem [resolvable:$false] %s818_s24 }
  0x73   : > { %s820_s7 = scalar_lea.vmem %s819_s24, 256  ;;  %p821_p3 = scmp.lt.s32.totalorder %s1146_s13, %s819_s24 }
  0x74   : > { %633 = vmatpush3.bf16.msra.mxu0 %v632_v7  ;;  %p817_p10 = pneg %p816_p1  ;;  %p822_p5 = scmp.lt.s32.totalorder %s820_s7, %s814_s11 }
  0x75   : > { %639 = vmatpush3.bf16.msra.mxu1 %v638_v14 }
  0x76   : > { %p823_p9 = por %p822_p5, %p821_p3 }
  0x77   : > { %615 = vmatmul.mubr.msk.f32.vlgmr.msra.gmra.mrb[0].mxu0 %vm286_vm1, %v281_v8 }
  0x78   : > { %p824_p11 = pnand %p823_p9, %p817_p10 }
 0x14a   : > { %v356_v15 = vpop.f32.mrb[0].mxu0 }
 0x14b   : > { %360 = vst.msk [vmem:[#allocation2] sm:$0xff] %vm286_vm1, %v356_v15  ;;  %v616_v16 = vpop.f32.mrb[1].mxu0 }
 0x152   : > { %v361_v17 = vld [vmem:[#allocation2] sm:$0xff] }
 0x153   : > { %626 = vmatmul.mubr.msk.f32.vlgmr.msra.gmra.mrb[0].mxu1 %vm286_vm1, %v361_v17 }
 0x226   : > { %v443_v19 = vpop.f32.mrb[0].mxu1 }
 0x227   : > { %v444_v20 = vadd.f32 %v590_v18, %v443_v19  ;;  %v627_v21 = vpop.f32.mrb[1].mxu1 }
 0x229   : > { %447 = vst [vmem:[%s273_s12] sm:$0xff] %v444_v20 }
 0x22a   : > { %827 = shalt.err (!%p824_p11)
}
 0x22b   : > { %s828_s28 = scalar_lea.hbm %s1144_s10, 128  ;;  %s832_s21 = scalar_lea.hbm %s1197_s4, 256 }
 0x22c   : > { %p829_p0 = scmp.ne.s32.totalorder %s1144_s10, %s828_s28  ;;  %p833_p6 = scmp.lt.u32.totalorder %s1144_s10, %s1197_s4 }
 0x22d   : > { %p834_p7 = scmp.lt.u32.totalorder %s832_s21, %s828_s28  ;;  %p836_p8 = scmp.lt.u32.totalorder %s828_s28, %s1144_s10 }
 0x22e   : > { %p830_p4 = pnand %p829_p0, %p1212_p12 }
 0x22f   : > { %p835_p2 = por %p834_p7, %p833_p6 }
 0x230   : > { %p831_p13 = pneg %p830_p4 }
 0x231   : > { %p837_p1 = por %p836_p8, %p835_p2 }
 0x233   : > { %p838_p10 = pnand %p837_p1, %p831_p13 }
 0x235   : > { %841 = shalt.err (!%p838_p10)
}
 0x236   : > { %650 = dma.vmem_to_hbm [thread:$0]  (%p1212_p12), %s1146_s13, 128, %s1144_s10, %s449_s9  }
 0x237 PF: > { %s475_s27 = sand.u32 1, %s880_s15   ;;  %p1213_p3 = scmp.ne.s32.totalorder %s1205_s26, 0 }
 0x238   : > { %p1214_p5 = scmp.ge.s32.totalorder %s900_s20, 2  ;;  %s476_s12 = scalar_lea.sflag [#allocation5], %s475_s27 }
 0x23a   : > { %p664_p9 = pnand %p1214_p5, %p1213_p3 }
 0x23c   : > { %875 = dma.done.wait (!%p664_p9), %s476_s12, 128  }
 0x23d   : > { %877 = vsyncadd (!%p664_p9), %s476_s12, 4294967168  ;;  %s21_s20 = sadd.s32 1, %s900_s20   ;;  %s1215_s15 = smov %s884_s16 }
 0x23e   : > { %p18_p11 = scmp.ge.s32.totalorder %s21_s20, 4   ;;  %s1216_s16 = smov %s888_s17 }
 0x23f   : > { %s1217_s17 = smov %s1078_s22  ;;  %s1218_s18 = smov %s896_s19 }
 0x240   : > { %s1219_s19 = smov %s1221_s5  ;;  %20 = sbr.rel (!%p18_p11) target bundleno = 7 (0x7), region = 97 }
 0x247   :  { %481 = vsyncpa [#allocation4], 1 }
 0x248   :  { %483 = vsyncpa [#allocation4 + $0x1], 1 }
 0x249   :  { %484 = vsyncpa [#allocation7], 1 }
 0x24a   :  { %485 = vsyncpa [#allocation5], 1 }
 0x24b   :  { %487 = vsyncpa [#allocation5 + $0x1], 1 }

// kernel: tpu_custom_call.1
= control target key start
LH: loop header
LB: loop body
LE: loop exit
PB: predicated region body
PF: predicated region fallthrough
CT: control target
= control target key end

     0   :  { %9 = vsyncpa [#allocation4], 0  ;;  %s1193_s0 = inlined_call_operand.hbm [shape: f32[16,32], index: 0, kind: input, shape index: {}]   ;;  %s1194_s1 = inlined_call_operand.hbm [shape: f32[32,32], index: 1, kind: input, shape index: {}]   ;;  %s1195_s2 = inlined_call_operand.hbm [shape: f32[32,128], index: 2, kind: input, shape index: {}]   ;;  %s1196_s3 = inlined_call_operand.vmem [shape: f32[1,128], index: 3, kind: input, shape index: {}]   ;;  %s1197_s4 = inlined_call_operand.hbm [shape: f32[16,128], index: 4, kind: output, shape index: {}]  }
   0x1   :  { %11 = vsyncpa [#allocation4 + $0x1], 0 }
   0x2   :  { %12 = vsyncpa [#allocation7], 0 }
   0x3   :  { %13 = vsyncpa [#allocation5], 0 }
   0x4   :  { %15 = vsyncpa [#allocation5 + $0x1], 0  ;;  %s936_s15 = smov 0   ;;  %s938_s16 = smov 0  }
   0x5   :  { %s940_s17 = smov 0   ;;  %s942_s18 = smov 0  }
   0x6   :  { %s944_s19 = smov 0   ;;  %s946_s20 = smov 0  }
   0x7 LB: > { %s575_s21 = sadd.s32 4294967295, %s900_s20   ;;  %s576_s22 = sadd.s32 4294967294, %s900_s20   ;;  %s900_s20 = sphi %s946_s20, %s21_s20   ;;  %s896_s19 = sphi %s944_s19, %s1219_s19   ;;  %s892_s18 = sphi %s942_s18, %s1218_s18   ;;  %s888_s17 = sphi %s940_s17, %s1217_s17   ;;  %s884_s16 = sphi %s938_s16, %s1216_s16   ;;  %s880_s15 = sphi %s936_s15, %s1215_s15  }
   0x8   : > { %p53_p0 = scmp.ne.s32.totalorder %s884_s16, %s880_s15  ;;  %p970_p1 = scmp.eq.s32.totalorder %s575_s21, 0 }
   0x9   : > { %p974_p2 = scmp.eq.s32.totalorder %s575_s21, 1  ;;  %p158_p3 = scmp.eq.s32.totalorder %s576_s22, 1 }
   0xa   : > { %s1202_s23 = scalar_select %p970_p1, 1, 0 }
   0xb   : > { %p980_p4 = por %p970_p1, %p53_p0  ;;  %p577_p5 = scmp.ge.s32.totalorder %s900_s20, 1 }
   0xc   : > { %p985_p6 = por %p158_p3, %p53_p0  ;;  %p165_p7 = scmp.lt.s32.totalorder %s900_s20, 3 }
   0xd   : > { %s1204_s25 = scalar_select %p980_p4, 1, 0 }
   0xe   : > { %s1205_s26 = scalar_select %p985_p6, 1, 0 }
   0xf   : > { %p990_p8 = pnand %p577_p5, %p165_p7  ;;  %s902_s28 = smov [#allocation6]  }
  0x10   : > { %s177_s29 = sshll.u32 %s902_s28, 4  ;;  %s903_s5 = smov [#allocation8]   ;;  %s994_s29 = int_to_ptr.vmem [resolvable:$true] %s177_s29 }
  0x11   : > { %p652_p9 = pneg %p990_p8  ;;  %s192_s6 = sshll.u32 %s903_s5, 4  ;;  %s1005_s6 = int_to_ptr.vmem [resolvable:$true] %s192_s6 }
  0x12   : > { %s728_s9 = scalar_lea.hbm %s1194_s1, 512 }
  0x13   : > { %p1001_p11 = pnand %p652_p9, %p970_p1  ;;  %p729_p12 = scmp.ne.s32.totalorder %s1194_s1, %s728_s9 }
  0x14   : > { %p735_p5 = scmp.lt.u32.totalorder %s728_s9, %s1194_s1 }
  0x15   : > { %p730_p13 = pneg %p1001_p11 }
  0x17   : > { %p731_p0 = pnand %p730_p13, %p729_p12 }
  0x19   : > { %p732_p3 = pneg %p731_p0 }
  0x1b   : > { %p737_p7 = pnand %p735_p5, %p732_p3 }
  0x1d   : > { %740 = shalt.err (!%p737_p7)
}
  0x1e   : > { %s741_s14 = scalar_lea.vmem %s994_s29, 512  ;;  %p749_p1 = scmp.lt.s32.totalorder %s994_s29, %s994_s29 }
  0x1f   : > { %p742_p9 = scmp.ne.s32.totalorder %s994_s29, %s741_s14  ;;  %p750_p12 = scmp.lt.s32.totalorder %s741_s14, %s741_s14 }
  0x21   : > { %p744_p10 = pnand %p742_p9, %p730_p13  ;;  %p751_p0 = por %p750_p12, %p749_p1 }
  0x23   : > { %p745_p6 = pneg %p744_p10 }
  0x25   : > { %p752_p4 = pnand %p751_p0, %p745_p6 }
  0x27   : > { %755 = shalt.err (!%p752_p4)
}
  0x28   : > { %s904_s21 = smov 128   ;;  %s905_s22 = smov 8  }
  0x29   : > { %655 = dma.hbm_to_vmem [thread:$0]  (!%p1001_p11), %s1194_s1, 512, %s994_s29, [#allocation7], %s904_s21, %s904_s21, %s905_s22  }
  0x2a   : > { %s756_s9 = scalar_lea.hbm %s1195_s2, 512 }
  0x2b   : > { %p757_p1 = scmp.ne.s32.totalorder %s1195_s2, %s756_s9  ;;  %p763_p10 = scmp.lt.u32.totalorder %s756_s9, %s1195_s2 }
  0x2d   : > { %p759_p4 = pnand %p757_p1, %p730_p13 }
  0x2f   : > { %p760_p6 = pneg %p759_p4 }
  0x31   : > { %p765_p3 = pnand %p763_p10, %p760_p6 }
  0x33   : > { %768 = shalt.err (!%p765_p3)
}
  0x34   : > { %s769_s29 = scalar_lea.vmem %s1005_s6, 512  ;;  %p777_p12 = scmp.lt.s32.totalorder %s1005_s6, %s1005_s6 }
  0x35   : > { %p770_p5 = scmp.ne.s32.totalorder %s1005_s6, %s769_s29  ;;  %p778_p0 = scmp.lt.s32.totalorder %s769_s29, %s769_s29 }
  0x37   : > { %p772_p7 = pnand %p770_p5, %p730_p13  ;;  %p779_p1 = por %p778_p0, %p777_p12 }
  0x39   : > { %p773_p9 = pneg %p772_p7 }
  0x3b   : > { %p780_p4 = pnand %p779_p1, %p773_p9 }
  0x3d   : > { %783 = shalt.err (!%p780_p4)
}
  0x3e   : > { %658 = dma.hbm_to_vmem [thread:$0]  (!%p1001_p11), %s1195_s2, 512, %s1005_s6, [#allocation7], %s904_s21, %s904_s21, %s905_s22  }
  0x3f   : > { %s33_s5 = sadd.s32 1, %s896_s19  ;;  %s40_s7 = sadd.s32 1, %s888_s17 }
  0x40   : > { %p35_p13 = scmp.ge.s32.totalorder %s33_s5, 2  ;;  %p47_p6 = scmp.ne.s32.totalorder %s888_s17, %s884_s16 }
  0x41   : > { %p48_p10 = scmp.eq.s32.totalorder %s900_s20, 0  ;;  %p669_p3 = scmp.lt.s32.totalorder %s900_s20, 2 }
  0x42   : > { %s1221_s5 = smov (%p35_p13, %s33_s5), 0  ;;  %p1069_p7 = por %p974_p2, %p47_p6 }
  0x43   : > { %p49_p5 = por %p48_p10, %p47_p6  ;;  %s37_s8 = ssub.s32 %s896_s19, %s1221_s5 }
  0x44   : > { %s1208_s30 = scalar_select %p1069_p7, 1, 0 }
  0x45   : > { %s212_s9 = sand.u32 1, %s888_s17   ;;  %p38_p9 = scmp.eq.s32.totalorder %s37_s8, 0 }
  0x46   : > { %s582_s6 = sshll.u32 %s212_s9, 3  ;;  %s583_s21 = sshll.u32 %s896_s19, 7 }
  0x47   : > { %s1078_s22 = scalar_select %p38_p9, %s888_s17, %s40_s7  }
  0x48   : > { %s1083_s12 = scalar_lea.hbm %s1193_s0, %s583_s21  ;;  %s216_s24 = scalar_lea.vmem [#allocation3], %s582_s6 }
  0x49   : > { %s223_s13 = sshll.u32 %s216_s24, 4  ;;  %p1087_p2 = pnand %p669_p3, %p49_p5  ;;  %s1091_s13 = int_to_ptr.vmem [resolvable:$true] %s223_s13 }
  0x4a   : > { %s213_s14 = scalar_lea.sflag [#allocation4], %s212_s9  ;;  %s784_s28 = scalar_lea.hbm %s1083_s12, 128 }
  0x4b   : > { %p785_p11 = scmp.ne.s32.totalorder %s1083_s12, %s784_s28  ;;  %p786_p12 = pneg %p1087_p2 }
  0x4c   : > { %s789_s6 = scalar_lea.hbm %s1193_s0, 256  ;;  %p790_p4 = scmp.lt.u32.totalorder %s1083_s12, %s1193_s0 }
  0x4d   : > { %p787_p0 = pnand %p786_p12, %p785_p11  ;;  %p791_p13 = scmp.lt.u32.totalorder %s789_s6, %s784_s28 }
  0x4e   : > { %p793_p10 = scmp.lt.u32.totalorder %s784_s28, %s1083_s12 }
  0x4f   : > { %p788_p1 = pneg %p787_p0  ;;  %p792_p6 = por %p791_p13, %p790_p4 }
  0x51   : > { %p794_p3 = por %p793_p10, %p792_p6 }
  0x53   : > { %p795_p5 = pnand %p794_p3, %p788_p1 }
  0x55   : > { %798 = shalt.err (!%p795_p5)
}
  0x56   : > { %s799_s9 = scalar_lea.vmem %s1091_s13, 128  ;;  %s906_s11 = smov [#allocation3]  }
  0x57   : > { %p800_p9 = scmp.ne.s32.totalorder %s1091_s13, %s799_s9  ;;  %s804_s24 = sshll.u32 %s906_s11, 4  ;;  %s805_s24 = int_to_ptr.vmem [resolvable:$false] %s804_s24 }
  0x58   : > { %s806_s7 = scalar_lea.vmem %s805_s24, 256  ;;  %p807_p7 = scmp.lt.s32.totalorder %s1091_s13, %s805_s24 }
  0x59   : > { %p802_p11 = pnand %p800_p9, %p786_p12  ;;  %p808_p4 = scmp.lt.s32.totalorder %s806_s7, %s799_s9 }
  0x5b   : > { %p803_p0 = pneg %p802_p11  ;;  %p809_p13 = por %p808_p4, %p807_p7 }
  0x5d   : > { %p810_p6 = pnand %p809_p13, %p803_p0 }
  0x5f   : > { %813 = shalt.err (!%p810_p6)
}
  0x60   : > { %662 = dma.hbm_to_vmem [thread:$0]  (!%p1087_p2), %s1083_s12, 128, %s1091_s13, %s213_s14  }
  0x61   : > { %232 = sbr.rel (%p990_p8) target bundleno = 567 (0x237), region = 36  ;;  %s1121_s28 = sand.u32 (!%p990_p8), 1, %s884_s16  }
  0x62   : > { %s585_s8 = sshll.u32 (!%p990_p8), %s1121_s28, 3  ;;  %s235_s6 = scalar_lea.sflag (!%p990_p8), [#allocation4], %s1121_s28 }
  0x63   : > { %s238_s21 = scalar_lea.vmem (!%p990_p8), [#allocation3], %s585_s8  ;;  %p1210_p7 = scmp.ne.s32.totalorder (!%p990_p8), %s1204_s25, 0 }
  0x68   : > { %867 = dma.done.wait (%p1210_p7), %s235_s6, 128  }
  0x69   : > { %869 = vsyncadd (%p1210_p7), %s235_s6, 4294967168  ;;  %p1211_p2 = scmp.ne.s32.totalorder %s1202_s23, 0 }
  0x6b   : > { %871 = dma.done.wait (%p1211_p2), [#allocation7], 1024  }
  0x6c   : > { %873 = vsyncadd (%p1211_p2), [#allocation7], 4294966272  ;;  %v907_v0 = vmov 0.0|0.0   ;;  %vm908_vm0 = vmmov 0   ;;  %v909_v1 = vmov 0.0   ;;  %v282_v2 = vld [vmem:[#allocation6] sm:$0xff] }
  0x6d   : > { %628 = vmatprep.subr.bf16.mxu0 %v907_v0  ;;  %614 = vmatprep.mubr.msk.f32.mxu0 %vm908_vm0, %v909_v1  ;;  %v283_v3 = vld [vmem:[#allocation6 + $0x8] sm:$0xff]  ;;  %v284_v4 = vld [vmem:[#allocation6 + $0x10] sm:$0xff]  ;;  %v285_v6 = vld [vmem:[#allocation6 + $0x18] sm:$0xff]  ;;  %vm286_vm1 = vcmask 261120   ;;  %s593_s27 = sshll.u32 %s892_s18, 7  ;;  %s273_s12 = scalar_lea.vmem [#allocation9], %s585_s8 }
  0x6e   : > { %634 = vmatprep.subr.bf16.mxu1 %v907_v0  ;;  %625 = vmatprep.mubr.msk.f32.mxu1 %vm908_vm0, %v909_v1  ;;  %v629_v5 = vpack.c.bf16 %v283_v3, %v282_v2  ;;  %v632_v7 = vpack.c.bf16 %v285_v6, %v284_v4  ;;  %v281_v8 = vld [vmem:[%s238_s21] sm:$0xff]  ;;  %v362_v9 = vld [vmem:[#allocation8] sm:$0xff]  ;;  %v363_v10 = vld [vmem:[#allocation8 + $0x8] sm:$0xff]  ;;  %s463_s13 = sshll.u32 %s273_s12, 4  ;;  %s1144_s10 = scalar_lea.hbm %s1197_s4, %s593_s27  ;;  %s1146_s13 = int_to_ptr.vmem [resolvable:$true] %s463_s13 }
  0x6f   : > { %v635_v11 = vpack.c.bf16 %v363_v10, %v362_v9  ;;  %v364_v12 = vld [vmem:[#allocation8 + $0x10] sm:$0xff]  ;;  %v365_v13 = vld [vmem:[#allocation8 + $0x18] sm:$0xff]  ;;  %v590_v18 = vld [vmem:[%s1196_s3] ss:$0 sm:$0xff]  ;;  %s449_s9 = scalar_lea.sflag [#allocation5], %s1121_s28  ;;  %s814_s11 = scalar_lea.vmem %s1146_s13, 128 }
  0x70   : > { %630 = vmatpush3.bf16.msra.mxu0 %v629_v5  ;;  %v638_v14 = vpack.c.bf16 %v365_v13, %v364_v12  ;;  %p815_p8 = scmp.ne.s32.totalorder %s1146_s13, %s814_s11  ;;  %p1212_p12 = scmp.ne.s32.totalorder %s1208_s30, 0 }
  0x71   : > { %631 = vmatprep.subr.bf16.mxu0 %v907_v0  ;;  %636 = vmatpush3.bf16.msra.mxu1 %v635_v11  ;;  %s910_s18 = smov [#allocation9]  }
  0x72   : > { %637 = vmatprep.subr.bf16.mxu1 %v907_v0  ;;  %p816_p1 = pnand %p815_p8, %p1212_p12  ;;  %s818_s24 = sshll.u32 %s910_s18, 4  ;;  %s819_s24 = int_to_ptr.vmem [resolvable:$false] %s818_s24 }
  0x73   : > { %s820_s7 = scalar_lea.vmem %s819_s24, 256  ;;  %p821_p3 = scmp.lt.s32.totalorder %s1146_s13, %s819_s24 }
  0x74   : > { %633 = vmatpush3.bf16.msra.mxu0 %v632_v7  ;;  %p817_p10 = pneg %p816_p1  ;;  %p822_p5 = scmp.lt.s32.totalorder %s820_s7, %s814_s11 }
  0x75   : > { %639 = vmatpush3.bf16.msra.mxu1 %v638_v14 }
  0x76   : > { %p823_p9 = por %p822_p5, %p821_p3 }
  0x77   : > { %615 = vmatmul.mubr.msk.f32.vlgmr.msra.gmra.mrb[0].mxu0 %vm286_vm1, %v281_v8 }
  0x78   : > { %p824_p11 = pnand %p823_p9, %p817_p10 }
 0x14a   : > { %v356_v15 = vpop.f32.mrb[0].mxu0 }
 0x14b   : > { %360 = vst.msk [vmem:[#allocation2] sm:$0xff] %vm286_vm1, %v356_v15  ;;  %v616_v16 = vpop.f32.mrb[1].mxu0 }
 0x152   : > { %v361_v17 = vld [vmem:[#allocation2] sm:$0xff] }
 0x153   : > { %626 = vmatmul.mubr.msk.f32.vlgmr.msra.gmra.mrb[0].mxu1 %vm286_vm1, %v361_v17 }
 0x226   : > { %v443_v19 = vpop.f32.mrb[0].mxu1 }
 0x227   : > { %v444_v20 = vadd.f32 %v590_v18, %v443_v19  ;;  %v627_v21 = vpop.f32.mrb[1].mxu1 }
 0x229   : > { %447 = vst [vmem:[%s273_s12] sm:$0xff] %v444_v20 }
 0x22a   : > { %827 = shalt.err (!%p824_p11)
}
 0x22b   : > { %s828_s28 = scalar_lea.hbm %s1144_s10, 128  ;;  %s832_s21 = scalar_lea.hbm %s1197_s4, 256 }
 0x22c   : > { %p829_p0 = scmp.ne.s32.totalorder %s1144_s10, %s828_s28  ;;  %p833_p6 = scmp.lt.u32.totalorder %s1144_s10, %s1197_s4 }
 0x22d   : > { %p834_p7 = scmp.lt.u32.totalorder %s832_s21, %s828_s28  ;;  %p836_p8 = scmp.lt.u32.totalorder %s828_s28, %s1144_s10 }
 0x22e   : > { %p830_p4 = pnand %p829_p0, %p1212_p12 }
 0x22f   : > { %p835_p2 = por %p834_p7, %p833_p6 }
 0x230   : > { %p831_p13 = pneg %p830_p4 }
 0x231   : > { %p837_p1 = por %p836_p8, %p835_p2 }
 0x233   : > { %p838_p10 = pnand %p837_p1, %p831_p13 }
 0x235   : > { %841 = shalt.err (!%p838_p10)
}
 0x236   : > { %650 = dma.vmem_to_hbm [thread:$0]  (%p1212_p12), %s1146_s13, 128, %s1144_s10, %s449_s9  }
 0x237 PF: > { %s475_s27 = sand.u32 1, %s880_s15   ;;  %p1213_p3 = scmp.ne.s32.totalorder %s1205_s26, 0 }
 0x238   : > { %p1214_p5 = scmp.ge.s32.totalorder %s900_s20, 2  ;;  %s476_s12 = scalar_lea.sflag [#allocation5], %s475_s27 }
 0x23a   : > { %p664_p9 = pnand %p1214_p5, %p1213_p3 }
 0x23c   : > { %875 = dma.done.wait (!%p664_p9), %s476_s12, 128  }
 0x23d   : > { %877 = vsyncadd (!%p664_p9), %s476_s12, 4294967168  ;;  %s21_s20 = sadd.s32 1, %s900_s20   ;;  %s1215_s15 = smov %s884_s16 }
 0x23e   : > { %p18_p11 = scmp.ge.s32.totalorder %s21_s20, 4   ;;  %s1216_s16 = smov %s888_s17 }
 0x23f   : > { %s1217_s17 = smov %s1078_s22  ;;  %s1218_s18 = smov %s896_s19 }
 0x240   : > { %s1219_s19 = smov %s1221_s5  ;;  %20 = sbr.rel (!%p18_p11) target bundleno = 7 (0x7), region = 97 }
 0x247   :  { %481 = vsyncpa [#allocation4], 1 }
 0x248   :  { %483 = vsyncpa [#allocation4 + $0x1], 1 }
 0x249   :  { %484 = vsyncpa [#allocation7], 1 }
 0x24a   :  { %485 = vsyncpa [#allocation5], 1 }
 0x24b   :  { %487 = vsyncpa [#allocation5 + $0x1], 1 }

</bundles_post_ra>
